<compile_context>
chip_gen: v5e
topology: v5e:2x2
jax: 0.10.0
libtpu: 0.0.40
codegen_flags: <defaults>
</compile_context>

<pallas_src>
import functools

import jax
import jax.numpy as jnp
from jax.experimental import pallas as pl
from jax.experimental.pallas import tpu as pltpu


# ------------------------- projection kernel ---------------------------------

def _project_kernel(h_ref, w_ref, dinv_ref, o_ref):
    """XW[i, :] = dinv[i] * (H[i, :] @ W_cat), emitted once per layer in bf16."""
    xw = jnp.dot(h_ref[...], w_ref[...], preferred_element_type=jnp.float32)
    o_ref[...] = (xw * dinv_ref[...]).astype(o_ref.dtype)


def project(h, w_cat, dinv_col, *, tm):
    n_pad, fin_cat = h.shape
    fout2 = w_cat.shape[1]
    return pl.pallas_call(
        _project_kernel,
        out_shape=jax.ShapeDtypeStruct((n_pad, fout2), jnp.bfloat16),
        grid_spec=pltpu.PrefetchScalarGridSpec(
            num_scalar_prefetch=0,
            grid=(n_pad // tm,),
            in_specs=[
                pl.BlockSpec((tm, fin_cat), lambda i: (i, 0)),      # H row tile
                pl.BlockSpec((fin_cat, fout2), lambda i: (0, 0)),   # W_cat (tiny, resident)
                pl.BlockSpec((tm, 1), lambda i: (i, 0)),            # dinv rows
            ],
            out_specs=pl.BlockSpec((tm, fout2), lambda i: (i, 0)),
        ),
        compiler_params=pltpu.CompilerParams(
            dimension_semantics=("parallel",)),
    )(h, w_cat, dinv_col)


# --------------------- adjacency (aggregation) kernel -------------------------

def _adj_layer_kernel(adj_ref, xw_ref, dinv_ref, b_ref, o_ref, acc_ref,
                      *, tk, fout, apply_softmax):
    """Grid = (row tiles 'parallel', K reduction 'arbitrary').

    acc[i] += (A+I)[i, k-tile] @ XW[k-tile]        (bf16 MXU, f32 accumulate)
    finalize: y = relu(dinv[i] * acc + b_cat)  [+ per-branch row softmax]
    """
    k = pl.program_id(1)

    @pl.when(k == 0)
    def _init():
        acc_ref[...] = jnp.zeros_like(acc_ref)

    # Streamed (tm, tk) bf16 (A+I) tile against the VMEM-resident bf16 XW slab.
    start = pl.multiple_of(k * tk, tk)
    acc_ref[...] += jnp.dot(adj_ref[...], xw_ref[pl.ds(start, tk), :],
                            preferred_element_type=jnp.float32)

    @pl.when(k == pl.num_programs(1) - 1)
    def _finalize():
        # Fold the row-side D^-1/2, add (GCNConv bias + Encoder scalar bias), ReLU.
        y = jnp.maximum(acc_ref[...] * dinv_ref[...] + b_ref[...], 0.0)
        if apply_softmax:
            # Per-branch row softmax over the lane-concatenated halves, done
            # with lane masks so the store stays one lane-dense slab.
            col = jax.lax.broadcasted_iota(jnp.int32, y.shape, 1)
            is_mu = col < fout
            neg = jnp.float32(-jnp.inf)
            m_mu = jnp.max(jnp.where(is_mu, y, neg), axis=1, keepdims=True)
            m_ls = jnp.max(jnp.where(is_mu, neg, y), axis=1, keepdims=True)
            e = jnp.exp(y - jnp.where(is_mu, m_mu, m_ls))
            s_mu = jnp.sum(jnp.where(is_mu, e, 0.0), axis=1, keepdims=True)
            s_ls = jnp.sum(jnp.where(is_mu, 0.0, e), axis=1, keepdims=True)
            s = jnp.where(is_mu, s_mu, s_ls)
            inv = pl.reciprocal(s, approx=True)     # EUP slot
            inv = inv * (2.0 - s * inv)             # one Newton step -> ~f32 accuracy
            y = e * inv
        o_ref[...] = y.astype(o_ref.dtype)


def adj_layer(adj, xw, dinv_col, b_cat, *, tm, tk, fout, apply_softmax, out_dtype):
    n_pad = adj.shape[0]
    fout2 = 2 * fout
    kernel = functools.partial(_adj_layer_kernel, tk=tk, fout=fout,
                               apply_softmax=apply_softmax)
    return pl.pallas_call(
        kernel,
        out_shape=jax.ShapeDtypeStruct((n_pad, fout2), out_dtype),
        grid_spec=pltpu.PrefetchScalarGridSpec(
            num_scalar_prefetch=0,
            grid=(n_pad // tm, n_pad // tk),
            in_specs=[
                pl.BlockSpec((tm, tk), lambda i, k: (i, k)),         # (A+I) tile, bf16
                pl.BlockSpec((n_pad, fout2), lambda i, k: (0, 0)),   # XW, fully resident
                pl.BlockSpec((tm, 1), lambda i, k: (i, 0)),          # dinv rows
                pl.BlockSpec((1, fout2), lambda i, k: (0, 0)),       # bias
            ],
            out_specs=pl.BlockSpec((tm, fout2), lambda i, k: (i, 0)),
            scratch_shapes=[pltpu.VMEM((tm, fout2), jnp.float32)],
        ),
        compiler_params=pltpu.CompilerParams(
            dimension_semantics=("parallel", "arbitrary")),
    )(adj, xw, dinv_col, b_cat)


# ------------------------------ wrappers --------------------------------------

def _round_up(x, m):
    return (x + m - 1) // m * m


def _choose_tiles(n):
    """Pick (n_pad, TM, TK).

    Small graphs: one full-extent tile (exempt from the (8,128) rule).
    Larger graphs: pad to a multiple of 256 (caps padding waste), pick large
    128-aligned tiles with TM <= n_pad/2 so the 'parallel' row axis has >= 2
    tiles for v7x's two TensorCores.  Worst-case VMEM (512x2048 bf16 A tile,
    double-buffered, plus the resident XW slab) stays well under the default
    scoped VMEM limit on v5e/v6e/v7x -> no vmem_limit_bytes override needed.
    """
    if n <= 256:
        n_pad = _round_up(n, 8)
        return n_pad, n_pad, n_pad
    n_pad = _round_up(n, 256)
    tm = next(t for t in (512, 384, 256, 128) if n_pad % t == 0 and t <= n_pad // 2)
    tk = next(t for t in (2048, 1024, 512, 256) if n_pad % t == 0)
    return n_pad, tm, tk


def build_graph(edge_index, num_nodes, n_pad):
    """Dense (A + I) with exact 0/1 entries (bf16) + D^-1/2 as an f32 column.

    Degree normalization is folded into the kernels, so no normalized adjacency
    value is ever rounded to bf16.
    """
    # TODO(synk): for realistic graphs this O(N^2) densification should be
    # replaced by a sparse/blocked formulation (and A kept resident across
    # layers / stored in 8 bits); it is JAX glue, not kernel work.
    src = edge_index[0]
    dst = edge_index[1]
    a = jnp.zeros((num_nodes, num_nodes), jnp.float32)
    a = a.at[dst, src].set(1.0)                       # A[dst, src] = 1
    a = a + jnp.eye(num_nodes, dtype=jnp.float32)     # self loops
    deg = jnp.sum(a, axis=1)
    dinv = jnp.where(deg > 0, jax.lax.rsqrt(deg), 0.0)
    a_pad = jnp.zeros((n_pad, n_pad), jnp.bfloat16)
    a_pad = a_pad.at[:num_nodes, :num_nodes].set(a.astype(jnp.bfloat16))
    dinv_pad = jnp.zeros((n_pad, 1), jnp.float32).at[:num_nodes, 0].set(dinv)
    return a_pad, dinv_pad


class EncoderPallas:
    """Mirrors VGAE/encoder.py::Encoder with deterministic synthetic parameters."""

    def __init__(self, number_of_x, number_of_classes, key):
        dims = []
        d = number_of_x
        while d >= number_of_classes:
            dims.append(d)
            d //= 2
        self.dims = dims
        self.params = []
        for i in range(len(dims) - 1):
            fin, fout = dims[i], dims[i + 1]
            key, k1, k2, k3, k4 = jax.random.split(key, 5)
            s = jnp.sqrt(6.0 / (fin + fout))              # glorot-uniform (GCNConv)
            w_mu = jax.random.uniform(k1, (fin, fout), jnp.float32, -s, s)
            w_ls = jax.random.uniform(k2, (fin, fout), jnp.float32, -s, s)
            bvec_mu = 0.01 * jax.random.normal(k3, (fout,), jnp.float32)  # GCNConv bias
            bvec_ls = 0.01 * jax.random.normal(k4, (fout,), jnp.float32)
            bs_mu = jnp.zeros((1,), jnp.float32)          # Encoder scalar biases (zeros)
            bs_ls = jnp.zeros((1,), jnp.float32)
            self.params.append((w_mu, w_ls, bvec_mu, bvec_ls, bs_mu, bs_ls))

    def __call__(self, x, edge_index):
        n = x.shape[0]
        n_pad, tm, tk = _choose_tiles(n)
        adj, dinv_col = build_graph(edge_index, n, n_pad)

        # Layer-0 state: node features, zero-padded rows (mu == logstd input).
        h = jnp.zeros((n_pad, x.shape[1]), jnp.float32).at[:n].set(x)

        num_layers = len(self.params)
        last_fout = self.params[-1][0].shape[1]
        for li, (w_mu, w_ls, bvec_mu, bvec_ls, bs_mu, bs_ls) in enumerate(self.params):
            fin, fout = w_mu.shape
            last = li == num_layers - 1
            if li == 0:
                # x is shared by both branches -> single lane-concat projection.
                w_cat = jnp.concatenate([w_mu, w_ls], axis=1)            # (fin, 2*fout)
            else:
                # Branches already lane-concatenated -> block-diagonal weights.
                z = jnp.zeros((fin, fout), jnp.float32)
                w_cat = jnp.concatenate(
                    [jnp.concatenate([w_mu, z], axis=1),
                     jnp.concatenate([z, w_ls], axis=1)], axis=0)        # (2*fin, 2*fout)
            b_cat = jnp.concatenate([bvec_mu + bs_mu, bvec_ls + bs_ls]).reshape(1, -1)
            # Hoisted projection: once per layer, dinv pre-scaled, emitted bf16.
            xw = project(h, w_cat.astype(h.dtype), dinv_col, tm=tm)
            # Streamed adjacency matmul + dinv/bias/ReLU (+ softmax) epilogue.
            h = adj_layer(adj, xw, dinv_col, b_cat, tm=tm, tk=tk, fout=fout,
                          apply_softmax=last,
                          out_dtype=jnp.float32 if last else jnp.bfloat16)

        mu = h[:n, :last_fout]
        logstd = h[:n, last_fout:]
        return mu, logstd


# --------------------------- pure-JAX reference --------------------------------

def encoder_reference(x, edge_index, params):
    """f32 end-to-end reference mirroring the PyTorch module."""
    n = x.shape[0]
    src, dst = edge_index[0], edge_index[1]
    a = jnp.zeros((n, n), jnp.float32).at[dst, src].set(1.0)
    a = a + jnp.eye(n, dtype=jnp.float32)
    deg = jnp.sum(a, axis=1)
    dinv = jnp.where(deg > 0, 1.0 / jnp.sqrt(deg), 0.0)
    a_hat = dinv[:, None] * a * dinv[None, :]
    mu, ls = x, x
    for (w_mu, w_ls, bvec_mu, bvec_ls, bs_mu, bs_ls) in params:
        mu = jnp.maximum(a_hat @ (mu @ w_mu) + bvec_mu + bs_mu, 0.0)
        ls = jnp.maximum(a_hat @ (ls @ w_ls) + bvec_ls + bs_ls, 0.0)
    return jax.nn.softmax(mu, axis=1), jax.nn.softmax(ls, axis=1)


# --------------------------------- main ---------------------------------------

if __name__ == "__main__":
    key = jax.random.PRNGKey(0)
    k_x, k_p = jax.random.split(key)

    number_of_x = 32       # input feature dim
    number_of_classes = 4  # latent dim -> layer widths 32 -> 16 -> 8 -> 4
    num_nodes = 8

    # Node features (num_nodes, number_of_x)
    x = jax.random.normal(k_x, (num_nodes, number_of_x), jnp.float32)

    # Symmetric ring graph: edge_index of shape (2, 2*num_nodes)
    idx = jnp.arange(num_nodes)
    src = jnp.concatenate([idx, (idx + 1) % num_nodes])
    dst = jnp.concatenate([(idx + 1) % num_nodes, idx])
    edge_index = jnp.stack([src, dst]).astype(jnp.int32)

    enc = EncoderPallas(number_of_x, number_of_classes, k_p)
    mu, logstd = enc(x, edge_index)
    jax.block_until_ready((mu, logstd))

    assert mu.shape == (num_nodes, number_of_classes)
    assert logstd.shape == (num_nodes, number_of_classes)
    # Softmax rows sum to 1 (normalization done in f32 in-kernel).
    assert jnp.allclose(jnp.sum(mu, axis=1), 1.0, atol=1e-4)
    assert jnp.allclose(jnp.sum(logstd, axis=1), 1.0, atol=1e-4)
    # Element-wise check against the pure-f32 reference (loose tolerance: the
    # kernel carries bf16 operands on the MXU path with f32 accumulation).
    mu_ref, logstd_ref = encoder_reference(x, edge_index, enc.params)
    assert jnp.allclose(mu, mu_ref, atol=3e-2), float(jnp.max(jnp.abs(mu - mu_ref)))
    assert jnp.allclose(logstd, logstd_ref, atol=3e-2), float(
        jnp.max(jnp.abs(logstd - logstd_ref)))

    print("KERNEL_OK")
</pallas_src>

<mosaic_0001>
module attributes {stable_mosaic.version = 11 : i64} {
  func.func @_project_kernel(%arg0: i32, %arg1: memref<8x32xf32, #tpu.memory_space<vmem>>, %arg2: memref<32x32xf32, #tpu.memory_space<vmem>>, %arg3: memref<8x1xf32, #tpu.memory_space<vmem>>, %arg4: memref<8x32xbf16, #tpu.memory_space<vmem>>) attributes {dimension_semantics = [#tpu.dimension_semantics<parallel>], iteration_bounds = array<i64: 1>, scalar_prefetch = 0 : i64, scratch_operands = 0 : i64, tpu.core_type = #tpu.core_type<tc>, window_params = [{transform_indices = @transform_0, window_bounds = array<i64: 8, 32>}, {pipeline_mode = #tpu.pipeline_mode<synchronous>, transform_indices = @transform_1, window_bounds = array<i64: 32, 32>}, {transform_indices = @transform_2, window_bounds = array<i64: 8, 1>}, {transform_indices = @transform_3, window_bounds = array<i64: 8, 32>}]} {
    %c0 = arith.constant 0 : index
    %c0_0 = arith.constant 0 : index
    %0 = vector.load %arg1[%c0, %c0_0] : memref<8x32xf32, #tpu.memory_space<vmem>>, vector<8x32xf32>
    %c0_1 = arith.constant 0 : index
    %c0_2 = arith.constant 0 : index
    %1 = vector.load %arg2[%c0_1, %c0_2] : memref<32x32xf32, #tpu.memory_space<vmem>>, vector<32x32xf32>
    %cst = arith.constant dense<0.000000e+00> : vector<8x32xf32>
    %2 = tpu.matmul %0, %1, %cst {dimension_numbers = #tpu.dot_dimension_numbers<[1], [0], [0], [1], [0, 0, 1, 1], [], []>} : vector<8x32xf32>, vector<32x32xf32>, vector<8x32xf32> -> vector<8x32xf32>
    %c0_3 = arith.constant 0 : index
    %c0_4 = arith.constant 0 : index
    %3 = vector.load %arg3[%c0_3, %c0_4] : memref<8x1xf32, #tpu.memory_space<vmem>>, vector<8x1xf32>
    %4 = vector.broadcast %3 : vector<8x1xf32> to vector<8x32xf32>
    %5 = arith.mulf %2, %4 : vector<8x32xf32>
    %6 = arith.truncf %5 : vector<8x32xf32> to vector<8x32xbf16>
    %c0_5 = arith.constant 0 : index
    %c0_6 = arith.constant 0 : index
    %7 = vector.load %arg4[%c0_5, %c0_6] : memref<8x32xbf16, #tpu.memory_space<vmem>>, vector<8x32xbf16>
    tpu.vector_store %arg4[%c0_5, %c0_6], %6 {strides = array<i32>} : memref<8x32xbf16, #tpu.memory_space<vmem>>, vector<8x32xbf16>,
    return
  }
  func.func @transform_0(%arg0: i32) -> (i32, i32) {
    %c0_i32 = arith.constant 0 : i32
    %c0_i32_0 = arith.constant 0 : i32
    return %arg0, %c0_i32 : i32, i32
  }
  func.func @transform_1(%arg0: i32) -> (i32, i32) {
    %c0_i32 = arith.constant 0 : i32
    %c0_i32_0 = arith.constant 0 : i32
    %c0_i32_1 = arith.constant 0 : i32
    return %c0_i32, %c0_i32_0 : i32, i32
  }
  func.func @transform_2(%arg0: i32) -> (i32, i32) {
    %c0_i32 = arith.constant 0 : i32
    %c0_i32_0 = arith.constant 0 : i32
    return %arg0, %c0_i32 : i32, i32
  }
  func.func @transform_3(%arg0: i32) -> (i32, i32) {
    %c0_i32 = arith.constant 0 : i32
    %c0_i32_0 = arith.constant 0 : i32
    return %arg0, %c0_i32 : i32, i32
  }
}

</mosaic_0001>

<bundles_post_ra>
// kernel: tpu_custom_call.1
= control target key start
LH: loop header
LB: loop body
LE: loop exit
PB: predicated region body
PF: predicated region fallthrough
CT: control target
= control target key end

     0   :  { %8 = vsyncpa [#allocation3], 0  ;;  %s183_s0 = inlined_call_operand.vmem [shape: f32[8,32], index: 0, kind: input, shape index: {}]   ;;  %s184_s1 = inlined_call_operand.hbm [shape: f32[32,32], index: 1, kind: input, shape index: {}]   ;;  %s185_s2 = inlined_call_operand.vmem [shape: f32[8,1], index: 2, kind: input, shape index: {}]   ;;  %s186_s3 = inlined_call_operand.hbm [shape: bf16[8,32], index: 3, kind: output, shape index: {}]  }
   0x1   :  { %9 = vsyncpa [#allocation4], 0  ;;  %s16_s14 = sshll.u32 %s184_s1, 4  ;;  %s146_s15 = smov [#allocation2]   ;;  %s17_s14 = int_to_ptr.hbm [resolvable:$true] %s16_s14 }
   0x2   :  { %s18_s16 = sshll.u32 %s146_s15, 4  ;;  %s147_s17 = smov 128   ;;  %s19_s16 = int_to_ptr.vmem [resolvable:$true] %s18_s16 }
   0x3   :  { %s148_s18 = smov 8  }
   0x4   :  { %24 = dma.hbm_to_vmem [thread:$0]  %s17_s14, 512, %s19_s16, [#allocation3], %s147_s17, %s147_s17, %s148_s18  }
   0x5   :  { %142 = dma.done.wait [#allocation3], 512  }
   0x6   :  { %143 = vsyncadd [#allocation3], 4294966784  ;;  %v149_v0 = vmov 0   ;;  %v35_v1 = vld [vmem:[#allocation2 + $0x18] sm:$0xff]  ;;  %v34_v2 = vld [vmem:[#allocation2 + $0x10] sm:$0xff]  ;;  %vm36_vm0 = vcmask 261120  }
   0x7   :  { %93 = vset.pattern.permute.xlu0 %v149_v0  ;;  %52 = vmatpush.msra.mxu0 %v35_v1  ;;  %v60_v3 = vld [vmem:[%s185_s2] sm:$0xff]  ;;  %v33_v4 = vld [vmem:[#allocation2 + $0x8] sm:$0xff]  ;;  %s150_s22 = smov [#allocation5]   ;;  %s77_s2 = sshll.u32 %s186_s3, 4  ;;  %vm68_vm1 = vcmask 257024   ;;  %s78_s2 = int_to_ptr.hbm [resolvable:$true] %s77_s2 }
   0x8   :  { %63 = vperm.xlu0 %93, %v60_v3   ;;  %v32_v5 = vld [vmem:[#allocation2] sm:$0xff]  ;;  %s75_s23 = sshll.u32 %s150_s22, 4  ;;  %s76_s23 = int_to_ptr.vmem [resolvable:$true] %s75_s23 }
   0x9   :  { %53 = vmatpush.msra.mxu0 %v34_v2  ;;  %v31_v6 = vld [vmem:[%s183_s0] sm:$0xff] }
   0xb   :  { %54 = vmatpush.msra.mxu0 %v33_v4 }
   0xd   :  { %55 = vmatpush.msra.mxu0 %v32_v5 }
   0xe   :  { %87 = vmatmul.msk.f32.vlgmr.msra.gmra.mxu0 %vm36_vm0, %v31_v6 }
  0x7a   :  { %v64_v7 = vpop.permute.xlu0 %63 }
  0x8b   :  { %v57_v8 = vpop.f32.mrf.mxu0 }
  0x8c   :  { %v66_v9 = vmul.f32 %v64_v7, %v57_v8 }
  0x8e   :  { %v67_v10 = vpack.c.bf16 %v66_v9, %v66_v9 }
  0x90   :  { %69 = vst.msk [vmem:[#allocation5] sm:$0xf] %vm68_vm1, %v67_v10 }
  0x91   :  { %80 = dma.vmem_to_hbm [thread:$0]  %s76_s23, 64, %s78_s2, [#allocation4]  }
  0x92   :  { %144 = dma.done.wait [#allocation4], 64  }
  0x93   :  { %145 = vsyncadd [#allocation4], 4294967232 }
  0x94   :  { %85 = vsyncpa [#allocation3], 1 }
  0x95   :  { %86 = vsyncpa [#allocation4], 1 }

</bundles_post_ra>
